<compile_context>
chip_gen: v6e
topology: v6e:2x2x1
jax: 0.10.0
libtpu: 0.0.40
codegen_flags: <defaults>
</compile_context>

<pallas_src>
import math
import functools

import jax
import jax.numpy as jnp
from jax.experimental import pallas as pl
from jax.experimental.pallas import tpu as pltpu

_INV_SQRT2 = 1.0 / math.sqrt(2.0)


def _mlp_kernel(x_ref, w1_ref, b1_ref, w2_ref, b2_ref, o_ref, acc_ref):
    h_idx = pl.program_id(1)

    @pl.when(h_idx == 0)
    def _init():
        # Fold the fc2 bias add into the accumulator initialization.
        acc_ref[...] = jnp.broadcast_to(
            b2_ref[...].astype(jnp.float32), acc_ref.shape)

    # fc1 slice: (tile_m, in_f) @ (in_f, tile_h) -> f32 accumulate on the MXU.
    h = jnp.dot(x_ref[...], w1_ref[...], preferred_element_type=jnp.float32)
    h = h + b1_ref[...].astype(jnp.float32)
    # Exact GELU (erf-based) — matches torch.nn.GELU() default.
    h = 0.5 * h * (1.0 + jax.lax.erf(h * _INV_SQRT2))

    # fc2 partial product over this hidden slice, accumulated in f32 scratch.
    acc_ref[...] += jnp.dot(h.astype(w2_ref.dtype), w2_ref[...],
                            preferred_element_type=jnp.float32)

    @pl.when(h_idx == pl.num_programs(1) - 1)
    def _store():
        o_ref[...] = acc_ref[...].astype(o_ref.dtype)


def _round_up(x, m):
    return (x + m - 1) // m * m


def _pick_tile_h(hid):
    """Hidden-dim tile: keep small hidden sizes resident, stream large ones."""
    if hid <= 1024:
        return hid
    for t in (512, 256, 128):
        if hid % t == 0:
            return t
    return hid  # odd hidden size: fall back to fully-resident weights


@functools.partial(jax.jit, static_argnames=("tile_m",))
def mlp_pallas(x, w1, b1, w2, b2, *, tile_m=256):
    """x: (..., in_features).  Returns (..., out_features)."""
    lead = x.shape[:-1]
    in_f = x.shape[-1]
    hid = w1.shape[1]
    out_f = w2.shape[1]

    tokens = 1
    for d in lead:
        tokens *= d
    x2 = x.reshape(tokens, in_f)

    # Lane-dense output stores: pad out_features up to a multiple of 128
    # (pads weights/bias only — no activation copy; real transformer dims are
    # usually already 128-aligned so this is a no-op).
    out_f_p = _round_up(out_f, 128)
    if out_f_p != out_f:
        w2 = jnp.pad(w2, ((0, 0), (0, out_f_p - out_f)))
        b2 = jnp.pad(b2, ((0, out_f_p - out_f),))
    b1_2d = b1.reshape(1, hid)
    b2_2d = b2.reshape(1, out_f_p)

    # Token tile: big enough to fill the MXU, clamped for small inputs.
    tm = _round_up(min(tile_m, _round_up(tokens, 8)), 8)
    num_m = pl.cdiv(tokens, tm)          # ragged last block — no padding copy

    # Hidden tile (reduction axis for fc2, streamed weights).
    th = _pick_tile_h(hid)
    num_h = hid // th

    flops = 2 * tokens * in_f * hid + 2 * tokens * hid * out_f_p
    bytes_accessed = (
        x2.size * x2.dtype.itemsize
        + w1.size * w1.dtype.itemsize + b1.size * b1.dtype.itemsize
        + w2.size * w2.dtype.itemsize + b2.size * b2.dtype.itemsize
        + tokens * out_f_p * x.dtype.itemsize)

    out = pl.pallas_call(
        _mlp_kernel,
        out_shape=jax.ShapeDtypeStruct((tokens, out_f_p), x.dtype),
        grid_spec=pltpu.PrefetchScalarGridSpec(
            num_scalar_prefetch=0,
            grid=(num_m, num_h),
            in_specs=[
                pl.BlockSpec((tm, in_f),    lambda i, h: (i, 0)),  # x (resident over h)
                pl.BlockSpec((in_f, th),    lambda i, h: (0, h)),  # w1 slice
                pl.BlockSpec((1, th),       lambda i, h: (0, h)),  # b1 slice
                pl.BlockSpec((th, out_f_p), lambda i, h: (h, 0)),  # w2 slice
                pl.BlockSpec((1, out_f_p),  lambda i, h: (0, 0)),  # b2 (resident)
            ],
            out_specs=pl.BlockSpec((tm, out_f_p), lambda i, h: (i, 0)),
            scratch_shapes=[pltpu.VMEM((tm, out_f_p), jnp.float32)],
        ),
        compiler_params=pltpu.CompilerParams(
            dimension_semantics=("parallel", "arbitrary"),
            vmem_limit_bytes=64 * 1024 * 1024,
        ),
        cost_estimate=pl.CostEstimate(
            flops=flops,
            transcendentals=tokens * hid,       # GELU erf
            bytes_accessed=bytes_accessed),
    )(x2, w1, b1_2d, w2, b2_2d)

    if out_f_p != out_f:
        out = out[:, :out_f]
    return out.reshape(*lead, out_f)


def _mlp_reference(x, w1, b1, w2, b2):
    hp = jax.lax.Precision.HIGHEST
    h = jnp.dot(x, w1, precision=hp) + b1
    h = 0.5 * h * (1.0 + jax.lax.erf(h * _INV_SQRT2))
    return jnp.dot(h, w2, precision=hp) + b2


def _make_params(key, in_f, hid, out_f, dtype=jnp.float32):
    k_w1, k_b1, k_w2, k_b2 = jax.random.split(key, 4)
    bound1 = 1.0 / math.sqrt(in_f)
    bound2 = 1.0 / math.sqrt(hid)
    w1 = jax.random.uniform(k_w1, (in_f, hid), dtype, -bound1, bound1)
    b1 = jax.random.uniform(k_b1, (hid,),      dtype, -bound1, bound1)
    w2 = jax.random.uniform(k_w2, (hid, out_f), dtype, -bound2, bound2)
    b2 = jax.random.uniform(k_b2, (out_f,),     dtype, -bound2, bound2)
    return w1, b1, w2, b2


if __name__ == "__main__":
    key = jax.random.PRNGKey(0)
    k1, k2, k3, k4 = jax.random.split(key, 4)

    # --- Test 1: small shapes consistent with a transformer-block MLP -------
    # batch=2, seq=8, in=32, hidden=64, out=32 (out < 128 exercises padding).
    B, N, IN, HID, OUT = 2, 8, 32, 64, 32
    x = jax.random.normal(k1, (B, N, IN), dtype=jnp.float32)
    w1, b1, w2, b2 = _make_params(k2, IN, HID, OUT)

    y = jax.block_until_ready(mlp_pallas(x, w1, b1, w2, b2))
    y_ref = _mlp_reference(x, w1, b1, w2, b2)
    assert y.shape == (B, N, OUT)
    assert jnp.allclose(y, y_ref, atol=1e-4, rtol=1e-4)

    # --- Test 2: ragged token grid + streamed hidden dimension --------------
    # tokens=300 (ragged vs tile_m=256), hidden=2048 -> 4 streamed h-steps.
    B2, N2, IN2, HID2, OUT2 = 2, 150, 128, 2048, 128
    x2 = jax.random.normal(k3, (B2, N2, IN2), dtype=jnp.float32)
    w1b, b1b, w2b, b2b = _make_params(k4, IN2, HID2, OUT2)

    y2 = jax.block_until_ready(mlp_pallas(x2, w1b, b1b, w2b, b2b))
    y2_ref = _mlp_reference(x2, w1b, b1b, w2b, b2b)
    assert y2.shape == (B2, N2, OUT2)
    assert jnp.allclose(y2, y2_ref, atol=2e-3, rtol=2e-3)

    print("KERNEL_OK")
</pallas_src>

<mosaic_0001>
module attributes {stable_mosaic.version = 11 : i64} {
  func.func @_mlp_kernel(%arg0: i32, %arg1: i32, %arg2: memref<16x32xf32, #tpu.memory_space<vmem>>, %arg3: memref<32x64xf32, #tpu.memory_space<vmem>>, %arg4: memref<1x64xf32, #tpu.memory_space<vmem>>, %arg5: memref<64x128xf32, #tpu.memory_space<vmem>>, %arg6: memref<1x128xf32, #tpu.memory_space<vmem>>, %arg7: memref<16x128xf32, #tpu.memory_space<vmem>>, %arg8: memref<16x128xf32, #tpu.memory_space<vmem>>) attributes {dimension_semantics = [#tpu.dimension_semantics<parallel>, #tpu.dimension_semantics<arbitrary>], iteration_bounds = array<i64: 1, 1>, scalar_prefetch = 0 : i64, scratch_operands = 1 : i64, tpu.core_type = #tpu.core_type<tc>, window_params = [{transform_indices = @transform_0, window_bounds = array<i64: 16, 32>}, {transform_indices = @transform_1, window_bounds = array<i64: 32, 64>}, {transform_indices = @transform_2, window_bounds = array<i64: 1, 64>}, {transform_indices = @transform_3, window_bounds = array<i64: 64, 128>}, {pipeline_mode = #tpu.pipeline_mode<synchronous>, transform_indices = @transform_4, window_bounds = array<i64: 1, 128>}, {transform_indices = @transform_5, window_bounds = array<i64: 16, 128>}]} {
    %c0_i32 = arith.constant 0 : i32
    %0 = arith.cmpi eq, %arg1, %c0_i32 : i32
    %1 = arith.extui %0 : i1 to i32
    %c0_i32_0 = arith.constant 0 : i32
    %2 = arith.cmpi ne, %1, %c0_i32_0 : i32
    scf.if %2 {
      %c0_18 = arith.constant 0 : index
      %c0_19 = arith.constant 0 : index
      %25 = vector.load %arg6[%c0_18, %c0_19] : memref<1x128xf32, #tpu.memory_space<vmem>>, vector<1x128xf32>
      %26 = vector.shape_cast %25 : vector<1x128xf32> to vector<1x128xf32>
      %27 = vector.broadcast %26 : vector<1x128xf32> to vector<16x128xf32>
      %c0_20 = arith.constant 0 : index
      %c0_21 = arith.constant 0 : index
      %28 = vector.load %arg8[%c0_20, %c0_21] : memref<16x128xf32, #tpu.memory_space<vmem>>, vector<16x128xf32>
      tpu.vector_store %arg8[%c0_20, %c0_21], %27 {strides = array<i32>} : memref<16x128xf32, #tpu.memory_space<vmem>>, vector<16x128xf32>,
    } else {
    }
    %c0 = arith.constant 0 : index
    %c0_1 = arith.constant 0 : index
    %3 = vector.load %arg2[%c0, %c0_1] : memref<16x32xf32, #tpu.memory_space<vmem>>, vector<16x32xf32>
    %c0_2 = arith.constant 0 : index
    %c0_3 = arith.constant 0 : index
    %4 = vector.load %arg3[%c0_2, %c0_3] : memref<32x64xf32, #tpu.memory_space<vmem>>, vector<32x64xf32>
    %cst = arith.constant dense<0.000000e+00> : vector<16x64xf32>
    %5 = tpu.matmul %3, %4, %cst {dimension_numbers = #tpu.dot_dimension_numbers<[1], [0], [0], [1], [0, 0, 1, 1], [], []>} : vector<16x32xf32>, vector<32x64xf32>, vector<16x64xf32> -> vector<16x64xf32>
    %c0_4 = arith.constant 0 : index
    %c0_5 = arith.constant 0 : index
    %6 = vector.load %arg4[%c0_4, %c0_5] : memref<1x64xf32, #tpu.memory_space<vmem>>, vector<1x64xf32>
    %7 = vector.broadcast %6 : vector<1x64xf32> to vector<16x64xf32>
    %8 = arith.addf %5, %7 : vector<16x64xf32>
    %cst_6 = arith.constant 5.000000e-01 : f32
    %9 = vector.broadcast %cst_6 : f32 to vector<16x64xf32>
    %10 = arith.mulf %9, %8 : vector<16x64xf32>
    %cst_7 = arith.constant 0.707106769 : f32
    %11 = vector.broadcast %cst_7 : f32 to vector<16x64xf32>
    %12 = arith.mulf %8, %11 : vector<16x64xf32>
    %13 = math.erf %12 : vector<16x64xf32>
    %cst_8 = arith.constant 1.000000e+00 : f32
    %14 = vector.broadcast %cst_8 : f32 to vector<16x64xf32>
    %15 = arith.addf %14, %13 : vector<16x64xf32>
    %16 = arith.mulf %10, %15 : vector<16x64xf32>
    %c0_9 = arith.constant 0 : index
    %c0_10 = arith.constant 0 : index
    %17 = vector.load %arg8[%c0_9, %c0_10] : memref<16x128xf32, #tpu.memory_space<vmem>>, vector<16x128xf32>
    %c0_11 = arith.constant 0 : index
    %c0_12 = arith.constant 0 : index
    %18 = vector.load %arg5[%c0_11, %c0_12] : memref<64x128xf32, #tpu.memory_space<vmem>>, vector<64x128xf32>
    %cst_13 = arith.constant dense<0.000000e+00> : vector<16x128xf32>
    %19 = tpu.matmul %16, %18, %cst_13 {dimension_numbers = #tpu.dot_dimension_numbers<[1], [0], [0], [1], [0, 0, 1, 1], [], []>} : vector<16x64xf32>, vector<64x128xf32>, vector<16x128xf32> -> vector<16x128xf32>
    %20 = arith.addf %17, %19 : vector<16x128xf32>
    %c0_14 = arith.constant 0 : index
    %c0_15 = arith.constant 0 : index
    %21 = vector.load %arg8[%c0_14, %c0_15] : memref<16x128xf32, #tpu.memory_space<vmem>>, vector<16x128xf32>
    tpu.vector_store %arg8[%c0_14, %c0_15], %20 {strides = array<i32>} : memref<16x128xf32, #tpu.memory_space<vmem>>, vector<16x128xf32>,
    %c0_i32_16 = arith.constant 0 : i32
    %22 = arith.cmpi eq, %arg1, %c0_i32_16 : i32
    %23 = arith.extui %22 : i1 to i32
    %c0_i32_17 = arith.constant 0 : i32
    %24 = arith.cmpi ne, %23, %c0_i32_17 : i32
    scf.if %24 {
      %c0_18 = arith.constant 0 : index
      %c0_19 = arith.constant 0 : index
      %25 = vector.load %arg8[%c0_18, %c0_19] : memref<16x128xf32, #tpu.memory_space<vmem>>, vector<16x128xf32>
      %c0_20 = arith.constant 0 : index
      %c0_21 = arith.constant 0 : index
      %26 = vector.load %arg7[%c0_20, %c0_21] : memref<16x128xf32, #tpu.memory_space<vmem>>, vector<16x128xf32>
      tpu.vector_store %arg7[%c0_20, %c0_21], %25 {strides = array<i32>} : memref<16x128xf32, #tpu.memory_space<vmem>>, vector<16x128xf32>,
    } else {
    }
    return
  }
  func.func @transform_0(%arg0: i32, %arg1: i32) -> (i32, i32) {
    %c0_i32 = arith.constant 0 : i32
    %c0_i32_0 = arith.constant 0 : i32
    return %arg0, %c0_i32 : i32, i32
  }
  func.func @transform_1(%arg0: i32, %arg1: i32) -> (i32, i32) {
    %c0_i32 = arith.constant 0 : i32
    %c0_i32_0 = arith.constant 0 : i32
    return %c0_i32, %arg1 : i32, i32
  }
  func.func @transform_2(%arg0: i32, %arg1: i32) -> (i32, i32) {
    %c0_i32 = arith.constant 0 : i32
    %c0_i32_0 = arith.constant 0 : i32
    return %c0_i32, %arg1 : i32, i32
  }
  func.func @transform_3(%arg0: i32, %arg1: i32) -> (i32, i32) {
    %c0_i32 = arith.constant 0 : i32
    %c0_i32_0 = arith.constant 0 : i32
    return %arg1, %c0_i32 : i32, i32
  }
  func.func @transform_4(%arg0: i32, %arg1: i32) -> (i32, i32) {
    %c0_i32 = arith.constant 0 : i32
    %c0_i32_0 = arith.constant 0 : i32
    %c0_i32_1 = arith.constant 0 : i32
    return %c0_i32, %c0_i32_0 : i32, i32
  }
  func.func @transform_5(%arg0: i32, %arg1: i32) -> (i32, i32) {
    %c0_i32 = arith.constant 0 : i32
    %c0_i32_0 = arith.constant 0 : i32
    return %arg0, %c0_i32 : i32, i32
  }
}

</mosaic_0001>

<bundles_post_ra>
// kernel: mlp_pallas.1
= control target key start
LH: loop header
LB: loop body
LE: loop exit
PB: predicated region body
PF: predicated region fallthrough
CT: control target
= control target key end

     0   :  { %vm46_vm0 = vcmask 261120   ;;  %vm148_vm1 = vcmask 523264   ;;  %s387_s1 = inlined_call_operand.vmem [shape: f32[32,64], index: 1, kind: input, shape index: {}]   ;;  %s388_s0 = inlined_call_operand.vmem [shape: f32[16,32], index: 0, kind: input, shape index: {}]   ;;  %s389_s3 = inlined_call_operand.vmem [shape: f32[64,128], index: 3, kind: input, shape index: {}]   ;;  %s390_s2 = inlined_call_operand.vmem [shape: f32[1,64], index: 2, kind: input, shape index: {}]   ;;  %s391_s4 = inlined_call_operand.vmem [shape: f32[1,128], index: 4, kind: input, shape index: {}]   ;;  %s392_s5 = inlined_call_operand.vmem [shape: f32[16,128], index: 5, kind: output, shape index: {}]  }
   0x1   :  { %v38_v0 = vld [vmem:[%s387_s1 + $0x18] sm:$0xff]  ;;  %v37_v1 = vld [vmem:[%s387_s1 + $0x10] sm:$0xff]  ;;  %v33_v2 = vld [vmem:[%s388_s0] sm:$0xff] }
   0x2   :  { %267 = vmatprep.subr.mxu0 %v38_v0  ;;  %v36_v3 = vld [vmem:[%s387_s1 + $0x8] sm:$0xff]  ;;  %275 = vmatprep.mubr.msk.f32.mxu0 %vm46_vm0, %v33_v2  ;;  %v35_v4 = vld [vmem:[%s387_s1] sm:$0xff]  ;;  %v147_v6 = vld [vmem:[%s389_s3 + $0x38] sm:$0xff] }
   0x3   :  { %268 = vmatpush3.msra.mxu0 %v38_v0  ;;  %v34_v5 = vld [vmem:[%s388_s0 + $0x8] sm:$0xff]  ;;  %278 = vmatprep.subr.mxu1 %v147_v6  ;;  %v146_v7 = vld [vmem:[%s389_s3 + $0x30] sm:$0xff]  ;;  %v144_v9 = vld [vmem:[%s389_s3 + $0x20] sm:$0xff] }
   0x4   :  { %269 = vmatprep.subr.mxu0 %v37_v1  ;;  %279 = vmatpush3.msra.mxu1 %v147_v6  ;;  %v145_v8 = vld [vmem:[%s389_s3 + $0x28] sm:$0xff]  ;;  %v143_v10 = vld [vmem:[%s389_s3 + $0x18] sm:$0xff]  ;;  %v142_v11 = vld [vmem:[%s389_s3 + $0x10] sm:$0xff] }
   0x5   :  { %270 = vmatpush3.msra.mxu0 %v37_v1  ;;  %280 = vmatprep.subr.mxu1 %v146_v7  ;;  %v141_v12 = vld [vmem:[%s389_s3 + $0x8] sm:$0xff]  ;;  %v140_v13 = vld [vmem:[%s389_s3] sm:$0xff] }
   0x6   :  { %271 = vmatprep.subr.mxu0 %v36_v3  ;;  %281 = vmatpush3.msra.mxu1 %v146_v7  ;;  %v246_v14 = vld [vmem:[%s390_s2] ss:$0 sm:$0xff] }
   0x7   :  { %272 = vmatpush3.msra.mxu0 %v36_v3  ;;  %282 = vmatprep.subr.mxu1 %v145_v8  ;;  %v245_v29 = vld [vmem:[%s391_s4] ss:$0 sm:$0xff] }
   0x8   :  { %273 = vmatprep.subr.mxu0 %v35_v4  ;;  %283 = vmatpush3.msra.mxu1 %v145_v8 }
   0x9   :  { %274 = vmatpush3.msra.mxu0 %v35_v4  ;;  %284 = vmatprep.subr.mxu1 %v144_v9 }
   0xa   :  { %276 = vmatmul.mubr.msk.f32.vlgmr.msra.gmra.mxu0 %vm46_vm0, %v34_v5  ;;  %285 = vmatpush3.msra.mxu1 %v144_v9 }
   0xb   :  { %286 = vmatprep.subr.mxu1 %v143_v10 }
   0xc   :  { %287 = vmatpush3.msra.mxu1 %v143_v10 }
   0xd   :  { %288 = vmatprep.subr.mxu1 %v142_v11 }
   0xe   :  { %289 = vmatpush3.msra.mxu1 %v142_v11 }
   0xf   :  { %290 = vmatprep.subr.mxu1 %v141_v12 }
  0x10   :  { %291 = vmatpush3.msra.mxu1 %v141_v12 }
  0x11   :  { %292 = vmatprep.subr.mxu1 %v140_v13 }
  0x12   :  { %293 = vmatpush3.msra.mxu1 %v140_v13 }
  0xca   :  { %v277_v15 = vpop.f32.mrf.mxu0 }
  0xcb   :  { %v125_v16 = vadd.f32 %v277_v15, %v246_v14 }
  0xcc   :  { %v119_v17 = vpop.f32.mrf.mxu0 }
  0xcd   :  { %v131_v18 = vmul.f32 0.70710677, %v125_v16  ;;  %v120_v19 = vadd.f32 %v246_v14, %v119_v17  ;;  %v129_v26 = vmul.f32 0.5, %v125_v16 }
  0xcf   :  { %297 = verf.f32 %v131_v18  ;;  %v130_v20 = vmul.f32 0.70710677, %v120_v19  ;;  %v128_v24 = vmul.f32 0.5, %v120_v19 }
  0xd1   :  { %299 = verf.f32 %v130_v20 }
  0xdc   :  { %v298_v21 = vpop.eup %297 }
  0xdd   :  { %v135_v23 = vadd.f32 1.0, %v298_v21 }
  0xde   :  { %v300_v22 = vpop.eup %299 }
  0xdf   :  { %v134_v25 = vadd.f32 1.0, %v300_v22  ;;  %v137_v28 = vmul.f32 %v135_v23, %v129_v26 }
  0xe1   :  { %v136_v27 = vmul.f32 %v134_v25, %v128_v24 }
  0xe3   :  { %294 = vmatprep.mubr.msk.f32.mxu1 %vm148_vm1, %v136_v27 }
  0xe4   :  { %295 = vmatmul.mubr.msk.f32.vlgmr.msra.gmra.mxu1 %vm148_vm1, %v137_v28 }
 0x1a4   :  { %v296_v30 = vpop.f32.mrf.mxu1 }
 0x1a5   :  { %v231_v31 = vadd.f32 %v296_v30, %v245_v29 }
 0x1a6   :  { %v221_v32 = vpop.f32.mrf.mxu1 }
 0x1a7   :  { %240 = vst [vmem:[%s392_s5 + $0x8] sm:$0xff] %v231_v31  ;;  %v230_v33 = vadd.f32 %v245_v29, %v221_v32 }
 0x1a9   :  { %239 = vst [vmem:[%s392_s5] sm:$0xff] %v230_v33 }

</bundles_post_ra>
